<compile_context>
chip_gen: v7x
topology: tpu7x:2x2x1
jax: 0.10.0
libtpu: 0.0.40
codegen_flags: <defaults>
</compile_context>

<pallas_src>
import jax
import jax.numpy as jnp
import numpy as np
from jax.experimental import pallas as pl
from jax.experimental.pallas import tpu as pltpu


# ---------------------------------------------------------------------------
# Constant column-combine matrix (built once on host; +-0.25 exact in bf16)
# ---------------------------------------------------------------------------
def _col_pair_matrix(tw):
    """Cm (tw, tw): cols [0, tw/2) sum adjacent column pairs, cols [tw/2, tw)
    take their differences, i.e. R @ Cm = [sums | diffs].  The 1/4 Haar scale
    is folded in (entries are +-0.25, exactly representable in bf16)."""
    twh = tw // 2
    m = np.zeros((tw, tw), np.float32)
    for j in range(twh):
        m[2 * j, j] = 1.0
        m[2 * j + 1, j] = 1.0
        m[2 * j, twh + j] = 1.0
        m[2 * j + 1, twh + j] = -1.0
    return m * 0.25


# ---------------------------------------------------------------------------
# Pallas kernel: one (row-tile, col-tile) of the collapsed (C*H, W) slab
# ---------------------------------------------------------------------------
def _haar_kernel(x_ref, c_ref, o_ref):
    # x_ref: (th, tw)   f32   -- th = 2*rb collapsed input rows, tw input cols
    # c_ref: (tw, tw)   bf16  -- column-pair sum/diff matrix (x 0.25)
    # o_ref: (4, rb, twh) f32 -- the four Haar sub-bands for this tile
    rb = o_ref.shape[1]
    twh = o_ref.shape[2]

    # Stage 1 (VPU, exact f32): row-pair sums / diffs via sublane-strided reads.
    even = x_ref[pl.ds(0, rb, stride=2), :]          # rows 0, 2, 4, ...
    odd = x_ref[pl.ds(1, rb, stride=2), :]           # rows 1, 3, 5, ...
    p = even + odd                                    # (rb, tw)
    q = even - odd                                    # (rb, tw)

    cm = c_ref[...]

    # Stage 2 (MXU): column-pair sums / diffs, Y = R @ Cm.  bf16x2 split keeps
    # ~1e-5 accuracy with f32 accumulation (no precision flags needed).
    def col_combine(r):
        hi = r.astype(jnp.bfloat16)
        lo = (r - hi.astype(jnp.float32)).astype(jnp.bfloat16)
        return (jnp.dot(hi, cm, preferred_element_type=jnp.float32)
                + jnp.dot(lo, cm, preferred_element_type=jnp.float32))

    yp = col_combine(p)                               # (rb, tw)
    yq = col_combine(q)                               # (rb, tw)

    # Quadrants of [yp; yq] are exactly the four Haar components (already /4).
    o_ref[0, :, :] = yp[:, :twh]                      # ( a + b + c + d ) / 4
    o_ref[1, :, :] = yp[:, twh:]                      # ( a - b + c - d ) / 4
    o_ref[2, :, :] = yq[:, :twh]                      # ( a + b - c - d ) / 4
    o_ref[3, :, :] = yq[:, twh:]                      # ( a - b - c + d ) / 4


# ---------------------------------------------------------------------------
# Tile pickers
# ---------------------------------------------------------------------------
def _pick_row_tile(cr, cap=512):
    """Row tile over the collapsed C*H axis: largest multiple-of-16 divisor
    <= cap (keeps rb a multiple of 8 -> aligned stores, tiles near the 512-row
    sweet spot); else the smallest multiple-of-16 divisor; else the full axis
    (bounded anyway because the column axis is tiled)."""
    div16 = [d for d in range(16, cr + 1, 16) if cr % d == 0]
    small = [d for d in div16 if d <= cap]
    if small:
        return max(small)
    if div16:
        return min(div16)
    return cr


def _pick_col_tile(w):
    """Column tile: 256 when it divides W (twh = 128 keeps output stores
    lane-aligned and caps the matmul contraction so the kernel stays
    memory-bound on every chip); otherwise the full width."""
    if w > 256 and w % 256 == 0:
        return 256
    return w


# ---------------------------------------------------------------------------
# Wrapper: HaarDownsampling.forward(x, rev=False)
# ---------------------------------------------------------------------------
def haar_downsampling_forward(x):
    """x: (N, C, H, W) -> (N, 4*C, H/2, W/2), matching the PyTorch module."""
    n, ch, h, w = x.shape
    assert h % 2 == 0 and w % 2 == 0, "H and W must be even"
    x = x.astype(jnp.float32)
    hh, wh = h // 2, w // 2
    cr, crh = ch * h, ch * hh                 # collapsed (C, H) row axis

    # Free reshape: row pairs never straddle plane boundaries (H is even).
    x2 = x.reshape(n, cr, w)

    th = _pick_row_tile(cr)                   # input rows per grid step
    rb = th // 2                              # output rows per grid step
    tw = _pick_col_tile(w)                    # input cols per grid step
    twh = tw // 2                             # output cols per grid step
    n_rt = cr // th
    n_ct = w // tw

    cmat = jnp.asarray(_col_pair_matrix(tw), dtype=jnp.bfloat16)   # (tw, tw)

    # Advisory cost hint for the XLA scheduler around the custom call.
    flops = int(n * cr * w * (4 * tw + 2))            # col matmuls (bf16x2) + row adds
    bytes_accessed = int(2 * x.size * 4 + tw * tw * 2)
    cost = pl.CostEstimate(flops=flops, transcendentals=0,
                           bytes_accessed=bytes_accessed)

    out = pl.pallas_call(
        _haar_kernel,
        out_shape=jax.ShapeDtypeStruct((n, 4, crh, wh), jnp.float32),
        grid=(n, n_rt, n_ct),
        in_specs=[
            # one (row-tile, col-tile) of the collapsed (C*H, W) slab
            pl.BlockSpec((None, th, tw), lambda i, r, j: (i, r, j)),
            # small constant combine matrix, same block for every grid step
            pl.BlockSpec((tw, tw), lambda i, r, j: (0, 0)),
        ],
        # lane-dense, (8,128)-aligned output block
        out_specs=pl.BlockSpec((None, 4, rb, twh),
                               lambda i, r, j: (i, 0, r, j)),
        compiler_params=pltpu.CompilerParams(
            dimension_semantics=("parallel", "parallel", "parallel")),
        cost_estimate=cost,
    )(x2, cmat)

    # Free reshape: (N, 4, C*Hh, Wh) == (N, 4, C, Hh, Wh) -> (N, 4*C, Hh, Wh);
    # channel index = k*C + c, exactly the PyTorch reshape/transpose/reshape.
    return out.reshape(n, 4 * ch, hh, wh)


# ---------------------------------------------------------------------------
# Pure-JAX reference mirroring the PyTorch module (grouped conv + shuffle)
# ---------------------------------------------------------------------------
def _haar_conv_weights(ch):
    w = np.ones((4, 1, 2, 2), np.float32)
    w[1, 0, 0, 1] = -1.0
    w[1, 0, 1, 1] = -1.0
    w[2, 0, 1, 0] = -1.0
    w[2, 0, 1, 1] = -1.0
    w[3, 0, 1, 0] = -1.0
    w[3, 0, 0, 1] = -1.0
    return np.concatenate([w] * ch, axis=0)          # (4*C, 1, 2, 2)


def ref_haar_forward(x):
    n, ch, h, w = x.shape
    kernel = jnp.asarray(_haar_conv_weights(ch))
    out = jax.lax.conv_general_dilated(
        x, kernel, window_strides=(2, 2), padding="VALID",
        dimension_numbers=("NCHW", "OIHW", "NCHW"),
        feature_group_count=ch,
        precision=jax.lax.Precision.HIGHEST) / 4.0
    out = out.reshape(n, ch, 4, h // 2, w // 2)
    out = jnp.transpose(out, (0, 2, 1, 3, 4))
    return out.reshape(n, 4 * ch, h // 2, w // 2)


# ---------------------------------------------------------------------------
if __name__ == "__main__":
    fwd = jax.jit(haar_downsampling_forward)

    # Small shape from the module spec (exercises full-width column blocks).
    N, C, H, W = 2, 4, 16, 16
    x = jax.random.normal(jax.random.PRNGKey(0), (N, C, H, W), jnp.float32)
    out = jax.block_until_ready(fwd(x))
    assert out.shape == (N, 4 * C, H // 2, W // 2), out.shape
    ref = jax.block_until_ready(ref_haar_forward(x))
    np.testing.assert_allclose(np.asarray(out), np.asarray(ref),
                               rtol=2e-4, atol=2e-4)

    # Second shape exercising the tiled-column (tw=256) path.
    N2, C2, H2, W2 = 1, 3, 64, 512
    x2 = jax.random.normal(jax.random.PRNGKey(0), (N2, C2, H2, W2),
                           jnp.float32)
    out2 = jax.block_until_ready(fwd(x2))
    assert out2.shape == (N2, 4 * C2, H2 // 2, W2 // 2), out2.shape
    ref2 = jax.block_until_ready(ref_haar_forward(x2))
    np.testing.assert_allclose(np.asarray(out2), np.asarray(ref2),
                               rtol=2e-4, atol=2e-4)

    print("KERNEL_OK")
</pallas_src>

<mosaic_0001>
module attributes {stable_mosaic.version = 11 : i64} {
  func.func @_haar_kernel(%arg0: i32, %arg1: i32, %arg2: i32, %arg3: memref<1x64x16xf32, #tpu.memory_space<vmem>>, %arg4: memref<16x16xbf16, #tpu.memory_space<vmem>>, %arg5: memref<1x4x32x8xf32, #tpu.memory_space<vmem>>) attributes {dimension_semantics = [#tpu.dimension_semantics<parallel>, #tpu.dimension_semantics<parallel>, #tpu.dimension_semantics<parallel>], iteration_bounds = array<i64: 2, 1, 1>, scalar_prefetch = 0 : i64, scratch_operands = 0 : i64, tpu.core_type = #tpu.core_type<tc>, window_params = [{transform_indices = @transform_0, window_bounds = array<i64: 1, 64, 16>}, {pipeline_mode = #tpu.pipeline_mode<synchronous>, transform_indices = @transform_1, window_bounds = array<i64: 16, 16>}, {transform_indices = @transform_2, window_bounds = array<i64: 1, 4, 32, 8>}]} {
    %c0 = arith.constant 0 : index
    %c0_0 = arith.constant 0 : index
    %c0_1 = arith.constant 0 : index
    %0 = tpu.strided_load %arg3[%c0, %c0_0, %c0_1] {strides = array<i32: 1, 2, 1>} : memref<1x64x16xf32, #tpu.memory_space<vmem>>, vector<1x32x16xf32>
    %1 = vector.shape_cast %0 : vector<1x32x16xf32> to vector<32x16xf32>
    %c0_2 = arith.constant 0 : index
    %c1 = arith.constant 1 : index
    %c0_3 = arith.constant 0 : index
    %2 = tpu.strided_load %arg3[%c0_2, %c1, %c0_3] {strides = array<i32: 1, 2, 1>} : memref<1x64x16xf32, #tpu.memory_space<vmem>>, vector<1x32x16xf32>
    %3 = vector.shape_cast %2 : vector<1x32x16xf32> to vector<32x16xf32>
    %4 = arith.addf %1, %3 : vector<32x16xf32>
    %5 = arith.subf %1, %3 : vector<32x16xf32>
    %c0_4 = arith.constant 0 : index
    %c0_5 = arith.constant 0 : index
    %6 = vector.load %arg4[%c0_4, %c0_5] : memref<16x16xbf16, #tpu.memory_space<vmem>>, vector<16x16xbf16>
    %7 = arith.truncf %4 : vector<32x16xf32> to vector<32x16xbf16>
    %8 = arith.extf %7 : vector<32x16xbf16> to vector<32x16xf32>
    %9 = arith.subf %4, %8 : vector<32x16xf32>
    %10 = arith.truncf %9 : vector<32x16xf32> to vector<32x16xbf16>
    %cst = arith.constant dense<0.000000e+00> : vector<32x16xf32>
    %11 = tpu.matmul %7, %6, %cst {dimension_numbers = #tpu.dot_dimension_numbers<[1], [0], [0], [1], [0, 0, 1, 1], [], []>} : vector<32x16xbf16>, vector<16x16xbf16>, vector<32x16xf32> -> vector<32x16xf32>
    %cst_6 = arith.constant dense<0.000000e+00> : vector<32x16xf32>
    %12 = tpu.matmul %10, %6, %cst_6 {dimension_numbers = #tpu.dot_dimension_numbers<[1], [0], [0], [1], [0, 0, 1, 1], [], []>} : vector<32x16xbf16>, vector<16x16xbf16>, vector<32x16xf32> -> vector<32x16xf32>
    %13 = arith.addf %11, %12 : vector<32x16xf32>
    %14 = arith.truncf %5 : vector<32x16xf32> to vector<32x16xbf16>
    %15 = arith.extf %14 : vector<32x16xbf16> to vector<32x16xf32>
    %16 = arith.subf %5, %15 : vector<32x16xf32>
    %17 = arith.truncf %16 : vector<32x16xf32> to vector<32x16xbf16>
    %cst_7 = arith.constant dense<0.000000e+00> : vector<32x16xf32>
    %18 = tpu.matmul %14, %6, %cst_7 {dimension_numbers = #tpu.dot_dimension_numbers<[1], [0], [0], [1], [0, 0, 1, 1], [], []>} : vector<32x16xbf16>, vector<16x16xbf16>, vector<32x16xf32> -> vector<32x16xf32>
    %cst_8 = arith.constant dense<0.000000e+00> : vector<32x16xf32>
    %19 = tpu.matmul %17, %6, %cst_8 {dimension_numbers = #tpu.dot_dimension_numbers<[1], [0], [0], [1], [0, 0, 1, 1], [], []>} : vector<32x16xbf16>, vector<16x16xbf16>, vector<32x16xf32> -> vector<32x16xf32>
    %20 = arith.addf %18, %19 : vector<32x16xf32>
    %21 = vector.extract_strided_slice %13 {offsets = [0, 0], sizes = [32, 8], strides = [1, 1]} : vector<32x16xf32> to vector<32x8xf32>
    %c0_9 = arith.constant 0 : index
    %c0_10 = arith.constant 0 : index
    %c0_11 = arith.constant 0 : index
    %c0_12 = arith.constant 0 : index
    %22 = vector.load %arg5[%c0_9, %c0_10, %c0_11, %c0_12] : memref<1x4x32x8xf32, #tpu.memory_space<vmem>>, vector<1x1x32x8xf32>
    %23 = vector.shape_cast %22 : vector<1x1x32x8xf32> to vector<32x8xf32>
    %24 = vector.shape_cast %21 : vector<32x8xf32> to vector<1x1x32x8xf32>
    tpu.vector_store %arg5[%c0_9, %c0_10, %c0_11, %c0_12], %24 {strides = array<i32>} : memref<1x4x32x8xf32, #tpu.memory_space<vmem>>, vector<1x1x32x8xf32>,
    %25 = vector.extract_strided_slice %13 {offsets = [0, 8], sizes = [32, 8], strides = [1, 1]} : vector<32x16xf32> to vector<32x8xf32>
    %c0_13 = arith.constant 0 : index
    %c1_14 = arith.constant 1 : index
    %c0_15 = arith.constant 0 : index
    %c0_16 = arith.constant 0 : index
    %26 = vector.load %arg5[%c0_13, %c1_14, %c0_15, %c0_16] : memref<1x4x32x8xf32, #tpu.memory_space<vmem>>, vector<1x1x32x8xf32>
    %27 = vector.shape_cast %26 : vector<1x1x32x8xf32> to vector<32x8xf32>
    %28 = vector.shape_cast %25 : vector<32x8xf32> to vector<1x1x32x8xf32>
    tpu.vector_store %arg5[%c0_13, %c1_14, %c0_15, %c0_16], %28 {strides = array<i32>} : memref<1x4x32x8xf32, #tpu.memory_space<vmem>>, vector<1x1x32x8xf32>,
    %29 = vector.extract_strided_slice %20 {offsets = [0, 0], sizes = [32, 8], strides = [1, 1]} : vector<32x16xf32> to vector<32x8xf32>
    %c0_17 = arith.constant 0 : index
    %c2 = arith.constant 2 : index
    %c0_18 = arith.constant 0 : index
    %c0_19 = arith.constant 0 : index
    %30 = vector.load %arg5[%c0_17, %c2, %c0_18, %c0_19] : memref<1x4x32x8xf32, #tpu.memory_space<vmem>>, vector<1x1x32x8xf32>
    %31 = vector.shape_cast %30 : vector<1x1x32x8xf32> to vector<32x8xf32>
    %32 = vector.shape_cast %29 : vector<32x8xf32> to vector<1x1x32x8xf32>
    tpu.vector_store %arg5[%c0_17, %c2, %c0_18, %c0_19], %32 {strides = array<i32>} : memref<1x4x32x8xf32, #tpu.memory_space<vmem>>, vector<1x1x32x8xf32>,
    %33 = vector.extract_strided_slice %20 {offsets = [0, 8], sizes = [32, 8], strides = [1, 1]} : vector<32x16xf32> to vector<32x8xf32>
    %c0_20 = arith.constant 0 : index
    %c3 = arith.constant 3 : index
    %c0_21 = arith.constant 0 : index
    %c0_22 = arith.constant 0 : index
    %34 = vector.load %arg5[%c0_20, %c3, %c0_21, %c0_22] : memref<1x4x32x8xf32, #tpu.memory_space<vmem>>, vector<1x1x32x8xf32>
    %35 = vector.shape_cast %34 : vector<1x1x32x8xf32> to vector<32x8xf32>
    %36 = vector.shape_cast %33 : vector<32x8xf32> to vector<1x1x32x8xf32>
    tpu.vector_store %arg5[%c0_20, %c3, %c0_21, %c0_22], %36 {strides = array<i32>} : memref<1x4x32x8xf32, #tpu.memory_space<vmem>>, vector<1x1x32x8xf32>,
    return
  }
  func.func @transform_0(%arg0: i32, %arg1: i32, %arg2: i32) -> (i32, i32, i32) {
    %c0_i32 = arith.constant 0 : i32
    return %arg0, %arg1, %arg2 : i32, i32, i32
  }
  func.func @transform_1(%arg0: i32, %arg1: i32, %arg2: i32) -> (i32, i32) {
    %c0_i32 = arith.constant 0 : i32
    %c0_i32_0 = arith.constant 0 : i32
    %c0_i32_1 = arith.constant 0 : i32
    return %c0_i32, %c0_i32_0 : i32, i32
  }
  func.func @transform_2(%arg0: i32, %arg1: i32, %arg2: i32) -> (i32, i32, i32, i32) {
    %c0_i32 = arith.constant 0 : i32
    %c0_i32_0 = arith.constant 0 : i32
    return %arg0, %c0_i32, %arg1, %arg2 : i32, i32, i32, i32
  }
}

</mosaic_0001>

<bundles_post_ra>
// kernel: haar_downsampling_forward.1
= control target key start
LH: loop header
LB: loop body
LE: loop exit
PB: predicated region body
PF: predicated region fallthrough
CT: control target
= control target key end

     0   :  { %7 = vsyncpa [#allocation3], 0  ;;  %s1064_s0 = inlined_call_operand.hbm [shape: f32[2,64,16], index: 0, kind: input, shape index: {}]   ;;  %s1065_s1 = inlined_call_operand.vmem [shape: bf16[16,16], index: 1, kind: input, shape index: {}]   ;;  %s1066_s2 = inlined_call_operand.vmem [shape: f32[2,4,32,8], index: 2, kind: output, shape index: {}]  }
   0x1   :  { %9 = vsyncpa [#allocation3 + $0x1], 0  ;;  %s895_s9 = smov 0   ;;  %s897_s10 = smov 0  }
   0x2   :  { %s899_s11 = smov 0   ;;  %s901_s12 = smov 0  }
   0x3   :  { %s903_s13 = smov 0   ;;  %s905_s14 = smov 0  }
   0x4 LB: > { %s648_s15 = sadd.s32 4294967295, %s874_s14   ;;  %s34_s16 = sadd.s32 1, %s870_s13  ;;  %s874_s14 = sphi %s905_s14, %s15_s14   ;;  %s870_s13 = sphi %s903_s13, %s1074_s13   ;;  %s866_s12 = sphi %s901_s12, %s1073_s12   ;;  %s862_s11 = sphi %s899_s11, %s1072_s11   ;;  %s858_s10 = sphi %s897_s10, %s1071_s10   ;;  %s854_s9 = sphi %s895_s9, %s1070_s9  }
   0x5   : > { %p36_p0 = scmp.ge.s32.totalorder %s34_s16, 2  ;;  %s45_s17 = sadd.s32 1, %s862_s11 }
   0x6   : > { %p52_p1 = scmp.ne.s32.totalorder %s862_s11, %s858_s10  ;;  %p53_p2 = scmp.eq.s32.totalorder %s874_s14, 0 }
   0x7   : > { %s1076_s16 = smov (%p36_p0, %s34_s16), 0  ;;  %p58_p4 = scmp.ne.s32.totalorder %s858_s10, %s854_s9 }
   0x8   : > { %p931_p3 = por %p53_p2, %p52_p1  ;;  %s38_s19 = ssub.s32 %s870_s13, %s1076_s16 }
   0x9   : > { %p59_p5 = scmp.eq.s32.totalorder %s648_s15, 0  ;;  %p43_p6 = scmp.eq.s32.totalorder %s38_s19, 0 }
   0xa   : > { %p741_p8 = scmp.lt.s32.totalorder %s874_s14, 2  ;;  %s136_s22 = sand.u32 1, %s862_s11  }
   0xb   : > { %p938_p7 = por %p59_p5, %p58_p4  ;;  %s689_s23 = sshll.u32 %s870_s13, 10 }
   0xc   : > { %s944_s21 = scalar_select %p43_p6, %s862_s11, %s45_s17  }
   0xd   : > { %s652_s24 = sshll.u32 %s136_s22, 6  ;;  %s951_s27 = scalar_lea.hbm %s1064_s0, %s689_s23 }
   0xe   : > { %s140_s28 = scalar_lea.vmem [#allocation2], %s652_s24  ;;  %p955_p9 = pnand %p741_p8, %p931_p3 }
   0xf   : > { %s150_s29 = sshll.u32 %s140_s28, 4  ;;  %s961_s3 = scalar_lea.sflag [#allocation3], %s136_s22  ;;  %s959_s29 = int_to_ptr.vmem [resolvable:$true] %s150_s29 }
  0x10   : > { %s794_s4 = scalar_lea.hbm %s951_s27, 1024  ;;  %p796_p11 = pneg %p955_p9 }
  0x11   : > { %p795_p10 = scmp.ne.s32.totalorder %s951_s27, %s794_s4  ;;  %s799_s7 = scalar_lea.hbm %s1064_s0, 2048 }
  0x12   : > { %p800_p0 = scmp.lt.u32.totalorder %s951_s27, %s1064_s0  ;;  %p801_p1 = scmp.lt.u32.totalorder %s799_s7, %s794_s4 }
  0x13   : > { %p797_p12 = pnand %p796_p11, %p795_p10  ;;  %p803_p3 = scmp.lt.u32.totalorder %s794_s4, %s951_s27 }
  0x14   : > { %p802_p2 = por %p801_p1, %p800_p0 }
  0x15   : > { %p798_p13 = pneg %p797_p12 }
  0x16   : > { %p804_p4 = por %p803_p3, %p802_p2 }
  0x18   : > { %p805_p5 = pnand %p804_p4, %p798_p13 }
  0x1a   : > { %808 = shalt.err (!%p805_p5)
}
  0x1b   : > { %s809_s15 = scalar_lea.vmem %s959_s29, 1024  ;;  %s876_s17 = smov [#allocation2]  }
  0x1c   : > { %p810_p6 = scmp.ne.s32.totalorder %s959_s29, %s809_s15  ;;  %s814_s18 = sshll.u32 %s876_s17, 4  ;;  %s815_s18 = int_to_ptr.vmem [resolvable:$false] %s814_s18 }
  0x1d   : > { %s816_s19 = scalar_lea.vmem %s815_s18, 2048  ;;  %p817_p12 = scmp.lt.s32.totalorder %s959_s29, %s815_s18 }
  0x1e   : > { %p812_p8 = pnand %p810_p6, %p796_p11  ;;  %p818_p0 = scmp.lt.s32.totalorder %s816_s19, %s809_s15 }
  0x20   : > { %p813_p10 = pneg %p812_p8  ;;  %p819_p1 = por %p818_p0, %p817_p12 }
  0x22   : > { %p820_p2 = pnand %p819_p1, %p813_p10 }
  0x24   : > { %823 = shalt.err (!%p820_p2)
}
  0x25   : > { %s877_s22 = smov 128   ;;  %s878_s23 = smov 8  }
  0x26   : > { %740 = dma.hbm_to_vmem [thread:$0]  (!%p955_p9), %s951_s27, 1024, %s959_s29, %s961_s3, %s877_s22, %s877_s22, %s878_s23  }
  0x27   : > { %p655_p11 = scmp.ge.s32.totalorder %s874_s14, 1  ;;  %p158_p13 = scmp.lt.s32.totalorder %s874_s14, 3 }
  0x29   : > { %p159_p3 = pnand %p655_p11, %p158_p13 }
  0x2a   : > { %s164_s24 = sand.u32 (!%p159_p3), 1, %s858_s10  }
  0x2b   : > { %162 = sbr.rel (%p159_p3) target bundleno = 418 (0x1a2), region = 28  ;;  %s656_s25 = sshll.u32 (!%p159_p3), %s164_s24, 6 }
  0x2c   : > { %s165_s26 = scalar_lea.sflag (!%p159_p3), [#allocation3], %s164_s24  ;;  %s168_s28 = scalar_lea.vmem (!%p159_p3), [#allocation2], %s656_s25 }
  0x32   : > { %849 = dma.done.wait (%p938_p7), %s165_s26, 1024  }
  0x33   : > { %851 = vsyncadd (%p938_p7), %s165_s26, 4294966272  ;;  %v793_v0 = vld [vmem:[%s1065_s1] sm:$0xff]   ;;  %v659_v2 = vld [vmem:[%s168_s28 + $0x10] ss:$2 sm:$0xff]  ;;  %vm254_vm0 = vcmask 130048   ;;  %p198_p7 = scmp.lt.s32.totalorder %s866_s12, 1 }
  0x34   : > { %v211_v1 = vld [vmem:[%s168_s28] ss:$2 sm:$0xff]  ;;  %v662_v3 = vld [vmem:[%s168_s28 + $0x1] ss:$2 sm:$0xff]  ;;  %703 = vmatprep.subr.bf16.mxu0 %v793_v0  ;;  %715 = vmatprep.subr.bf16.mxu1 %v793_v0  ;;  %v663_v4 = vld [vmem:[%s168_s28 + $0x11] ss:$2 sm:$0xff] }
  0x35   : > { %v226_v5 = vadd.f32 %v662_v3, %v211_v1  ;;  %v230_v6 = vsub.f32 %v211_v1, %v662_v3  ;;  %v660_v7 = vld [vmem:[%s168_s28 + $0x20] ss:$2 sm:$0xff]  ;;  %v661_v8 = vld [vmem:[%s168_s28 + $0x30] ss:$2 sm:$0xff]  ;;  %704 = vmatpush3.bf16.msra.mxu0 %v793_v0  ;;  %716 = vmatpush3.bf16.msra.mxu1 %v793_v0  ;;  %v227_v9 = vadd.f32 %v663_v4, %v659_v2  ;;  %v664_v11 = vld [vmem:[%s168_s28 + $0x21] ss:$2 sm:$0xff] }
  0x36   : > { %v231_v10 = vsub.f32 %v659_v2, %v663_v4  ;;  %v665_v12 = vld [vmem:[%s168_s28 + $0x31] ss:$2 sm:$0xff]  ;;  %709 = vmatprep.subr.bf16.mxu0 %v793_v0  ;;  %v228_v13 = vadd.f32 %v664_v11, %v660_v7  ;;  %v232_v15 = vsub.f32 %v660_v7, %v664_v11  ;;  %721 = vmatprep.subr.bf16.mxu1 %v793_v0  ;;  %s1078_s12 = smov (!%p198_p7, %s866_s12), 1  ;;  %vm487_vm1 = vcmask 64512  }
  0x37   : > { %v229_v14 = vadd.f32 %v665_v12, %v661_v8  ;;  %v233_v16 = vsub.f32 %v661_v8, %v665_v12  ;;  %v236_v17 = vpack.c.bf16 %v227_v9, %v226_v5  ;;  %s690_s20 = sshll.u32 %s1078_s12, 7  ;;  %s879_s12 = smov 120  }
  0x38   : > { %v365_v18 = vpack.c.bf16 %v231_v10, %v230_v6  ;;  %s1012_s30 = scalar_lea.vmem %s1066_s2, %s690_s20 }
  0x39   : > { %v237_v19 = vpack.c.bf16 %v229_v14, %v228_v13  ;;  %v366_v20 = vpack.c.bf16 %v233_v16, %v232_v15  ;;  %v238_v21 = vunpack.c.l.bf16 %v236_v17  ;;  %v239_v22 = vunpack.c.h.bf16 %v236_v17 }
  0x3a   : > { %v367_v23 = vunpack.c.l.bf16 %v365_v18  ;;  %v368_v24 = vunpack.c.h.bf16 %v365_v18 }
  0x3b   : > { %v240_v25 = vunpack.c.l.bf16 %v237_v19  ;;  %v241_v26 = vunpack.c.h.bf16 %v237_v19  ;;  %v369_v27 = vunpack.c.l.bf16 %v366_v20  ;;  %v370_v28 = vunpack.c.h.bf16 %v366_v20 }
  0x3c   : > { %v242_v29 = vsub.f32 %v226_v5, %v238_v21  ;;  %v243_v30 = vsub.f32 %v227_v9, %v239_v22  ;;  %v371_v31 = vsub.f32 %v230_v6, %v367_v23  ;;  %v372_v32 = vsub.f32 %v231_v10, %v368_v24 }
  0x3d   : > { %v244_v33 = vsub.f32 %v228_v13, %v240_v25  ;;  %v245_v34 = vsub.f32 %v229_v14, %v241_v26  ;;  %v373_v35 = vsub.f32 %v232_v15, %v369_v27  ;;  %v374_v36 = vsub.f32 %v233_v16, %v370_v28 }
  0x3e   : > { %v246_v37 = vpack.c.bf16 %v243_v30, %v242_v29  ;;  %v375_v38 = vpack.c.bf16 %v372_v32, %v371_v31 }
  0x3f   : > { %v247_v39 = vpack.c.bf16 %v245_v34, %v244_v33  ;;  %v376_v40 = vpack.c.bf16 %v374_v36, %v373_v35 }
  0x40   : > { %705 = vmatprep.mubr.msk.bf16.mxu0 %vm254_vm0, %v246_v37  ;;  %717 = vmatprep.mubr.msk.bf16.mxu1 %vm254_vm0, %v375_v38 }
  0x41   : > { %706 = vmatmul.mubr.msk.bf16.vlgmr.msra.gmra.mrb[0].mxu0 %vm254_vm0, %v247_v39  ;;  %718 = vmatmul.mubr.msk.bf16.vlgmr.msra.gmra.mrb[0].mxu1 %vm254_vm0, %v376_v40 }
  0x42   : > { %710 = vmatpush3.bf16.msra.mxu0 %v793_v0  ;;  %722 = vmatpush3.bf16.msra.mxu1 %v793_v0 }
  0x43   : > { %711 = vmatprep.mubr.msk.bf16.mxu0 %vm254_vm0, %v236_v17  ;;  %723 = vmatprep.mubr.msk.bf16.mxu1 %vm254_vm0, %v365_v18 }
  0x4d   : > { %712 = vmatmul.mubr.msk.bf16.vlgmr.msra.gmra.mrb[0].mxu0 %vm254_vm0, %v237_v19  ;;  %724 = vmatmul.mubr.msk.bf16.vlgmr.msra.gmra.mrb[0].mxu1 %vm254_vm0, %v366_v20 }
 0x120   : > { %v713_v41 = vpop.f32.mrb[0].mxu0  ;;  %v725_v42 = vpop.f32.mrb[0].mxu1 }
 0x121   : > { %490 = vst.msk [vmem:[%s1012_s30 + $0x10] sm:$0xff] %vm487_vm1, %v713_v41  ;;  %681 = vst.msk [vmem:[%s1012_s30 + $0x50] sm:$0xff] %vm487_vm1, %v725_v42  ;;  %v472_v43 = vpop.f32.mrb[1].mxu1  ;;  %500 = vrot.lane.b32.xlu1 %v713_v41, %s879_s12  ;;  %v350_v44 = vpop.f32.mrb[1].mxu0 }
 0x122   : > { %679 = vst.msk [vmem:[%s1012_s30 + $0x40] sm:$0xff] %vm487_vm1, %v472_v43  ;;  %488 = vst.msk [vmem:[%s1012_s30] sm:$0xff] %vm487_vm1, %v350_v44  ;;  %v726_v45 = vpop.f32.mrb[2].mxu1  ;;  %496 = vrot.lane.b32.xlu0 %v350_v44, %s879_s12  ;;  %v714_v46 = vpop.f32.mrb[2].mxu0 }
 0x123   : > { %682 = vst.msk [vmem:[%s1012_s30 + $0x58] sm:$0xff] %vm487_vm1, %v726_v45  ;;  %491 = vst.msk [vmem:[%s1012_s30 + $0x18] sm:$0xff] %vm487_vm1, %v714_v46  ;;  %v353_v47 = vpop.f32.mrb[3].mxu0  ;;  %v475_v48 = vpop.f32.mrb[3].mxu1 }
 0x124   : > { %489 = vst.msk [vmem:[%s1012_s30 + $0x8] sm:$0xff] %vm487_vm1, %v353_v47  ;;  %680 = vst.msk [vmem:[%s1012_s30 + $0x48] sm:$0xff] %vm487_vm1, %v475_v48 }
 0x125   : > { %502 = vrot.lane.b32.xlu1 %v714_v46, %s879_s12 }
 0x126   : > { %522 = vrot.lane.b32.xlu0 %v472_v43, %s879_s12 }
 0x129   : > { %524 = vrot.lane.b32.xlu1 %v475_v48, %s879_s12 }
 0x12a   : > { %498 = vrot.lane.b32.xlu0 %v353_v47, %s879_s12 }
 0x12d   : > { %528 = vrot.lane.b32.xlu1 %v726_v45, %s879_s12 }
 0x12e   : > { %526 = vrot.lane.b32.xlu0 %v725_v42, %s879_s12 }
 0x193   : > { %v501_v49 = vpop.permute.xlu1 %500 }
 0x194   : > { %677 = vst.msk [vmem:[%s1012_s30 + $0x30] sm:$0xff] %vm487_vm1, %v501_v49  ;;  %v497_v50 = vpop.permute.xlu0 %496 }
 0x195   : > { %675 = vst.msk [vmem:[%s1012_s30 + $0x20] sm:$0xff] %vm487_vm1, %v497_v50 }
 0x197   : > { %v503_v51 = vpop.permute.xlu1 %502 }
 0x198   : > { %678 = vst.msk [vmem:[%s1012_s30 + $0x38] sm:$0xff] %vm487_vm1, %v503_v51  ;;  %v523_v52 = vpop.permute.xlu0 %522 }
 0x199   : > { %683 = vst.msk [vmem:[%s1012_s30 + $0x60] sm:$0xff] %vm487_vm1, %v523_v52 }
 0x19b   : > { %v525_v53 = vpop.permute.xlu1 %524 }
 0x19c   : > { %684 = vst.msk [vmem:[%s1012_s30 + $0x68] sm:$0xff] %vm487_vm1, %v525_v53  ;;  %v499_v54 = vpop.permute.xlu0 %498 }
 0x19d   : > { %676 = vst.msk [vmem:[%s1012_s30 + $0x28] sm:$0xff] %vm487_vm1, %v499_v54 }
 0x19f   : > { %v529_v55 = vpop.permute.xlu1 %528 }
 0x1a0   : > { %686 = vst.msk [vmem:[%s1012_s30 + $0x78] sm:$0xff] %vm487_vm1, %v529_v55  ;;  %v527_v56 = vpop.permute.xlu0 %526 }
 0x1a1   : > { %685 = vst.msk [vmem:[%s1012_s30 + $0x70] sm:$0xff] %vm487_vm1, %v527_v56 }
 0x1a2 PF: > { %s15_s14 = sadd.s32 1, %s874_s14   ;;  %s1070_s9 = smov %s858_s10 }
 0x1a3   : > { %p12_p9 = scmp.ge.s32.totalorder %s15_s14, 4   ;;  %s1071_s10 = smov %s862_s11 }
 0x1a4   : > { %s1072_s11 = smov %s944_s21  ;;  %s1073_s12 = smov %s870_s13 }
 0x1a5   : > { %s1074_s13 = smov %s1076_s16  ;;  %14 = sbr.rel (!%p12_p9) target bundleno = 4 (0x4), region = 78 }
 0x1ac   :  { %575 = vsyncpa [#allocation3], 1 }
 0x1ad   :  { %577 = vsyncpa [#allocation3 + $0x1], 1 }

</bundles_post_ra>
